<compile_context>
chip_gen: v7x
topology: tpu7x:2x2x1
jax: 0.10.0
libtpu: 0.0.40
codegen_flags: <defaults>
</compile_context>

<pallas_src>
import jax
import jax.numpy as jnp
from jax.experimental import pallas as pl
from jax.experimental.pallas import tpu as pltpu


# ------------------------------ kernel ------------------------------

def attention_fusion_kernel(x1_ref, x2_ref, w_ref, fused_ref, a1_ref):
    """One batch instance per grid step; all operands VMEM resident."""
    x1 = x1_ref[...]                       # (N, D) f32
    x2 = x2_ref[...]                       # (N, D) f32
    w = w_ref[...]                         # (1, D) f32 — attention_weights row

    # tmp1 = x1 @ w as a VPU multiply + lane reduction (no MXU push).
    # NOTE: tmp2 = x2 @ w exists in the reference but is never used (dead).
    t1 = jnp.sum(x1 * w, axis=-1, keepdims=True)          # (N, 1)

    # softmax over dim 0 (across the N rows), numerically stabilized.
    m = jnp.max(t1, axis=0, keepdims=True)                 # (1, 1)
    e = jnp.exp(t1 - m)                                    # (N, 1)
    s = jnp.sum(e, axis=0, keepdims=True)                  # (1, 1)
    # approx=True (EUP) fails the 1e-5 parity check -> exact reciprocal.
    a1 = e * pl.reciprocal(s, approx=False)                # (N, 1)

    # fused = a1*x1 + (1-a1)*x2  ==  x2 + a1*(x1 - x2)   (fewer VPU ops,
    # no a2 broadcast, and a2 never materialized in-kernel).
    fused_ref[...] = x2 + a1 * (x1 - x2)
    a1_ref[...] = a1


# ------------------------------ wrappers ------------------------------

def attention_fusion_batched(x1, x2, attention_weights):
    """Batched forward: B independent AttentionFusion instances in ONE launch.

    x1, x2:              (B, N, D) float32
    attention_weights:   (D,)      float32
    Returns (fused (B,N,D), (alpha_1 (B,N), alpha_2 (B,N))).
    """
    b, n, d = x1.shape
    w_row = attention_weights.reshape(1, d).astype(jnp.float32)

    grid_spec = pltpu.PrefetchScalarGridSpec(
        num_scalar_prefetch=0,
        grid=(b,),
        in_specs=[
            # batch dim squeezed out of the kernel view -> kernel sees (N, D)
            pl.BlockSpec((None, n, d), lambda i: (i, 0, 0)),
            pl.BlockSpec((None, n, d), lambda i: (i, 0, 0)),
            pl.BlockSpec((1, d), lambda i: (0, 0)),        # shared weights
        ],
        out_specs=(
            pl.BlockSpec((None, n, d), lambda i: (i, 0, 0)),
            pl.BlockSpec((None, n, 1), lambda i: (i, 0, 0)),
        ),
    )

    fused, a1 = pl.pallas_call(
        attention_fusion_kernel,
        out_shape=(
            jax.ShapeDtypeStruct((b, n, d), jnp.float32),
            jax.ShapeDtypeStruct((b, n, 1), jnp.float32),
        ),
        grid_spec=grid_spec,
        # batch axis is embarrassingly parallel -> v7x shards it across its
        # two TensorCores; no-op on single-TC v5e/v6e.
        compiler_params=pltpu.CompilerParams(
            dimension_semantics=("parallel",)),
    )(x1.astype(jnp.float32), x2.astype(jnp.float32), w_row)

    a1 = a1.reshape(b, n)
    a2 = 1.0 - a1                          # computed outside the kernel
    return fused, (a1, a2)


def attention_fusion(x1, x2, attention_weights):
    """Single-instance forward matching the PyTorch module.

    x1, x2:              (N, D) float32
    attention_weights:   (D,)   float32
    Returns (fused_tensor, (alpha_1, alpha_2)).
    """
    fused, (a1, a2) = attention_fusion_batched(
        x1[None], x2[None], attention_weights)
    # TODO(synk): the PyTorch module converts alpha to numpy via
    # .detach().cpu().numpy(); here the alphas are returned as JAX arrays.
    # TODO(synk): D=32 (<128 lanes) makes loads/stores masked partial ops; if
    # the surrounding model allows, stack 4 heads along the last dim to 128
    # for lane-dense tiles.
    return fused[0], (a1[0], a2[0])


# ------------------------------ reference ------------------------------

def _reference(x1, x2, w):
    t1 = x1 @ w
    a1 = jax.nn.softmax(t1, axis=0)
    a2 = 1.0 - a1
    fused = a1[:, None] * x1 + a2[:, None] * x2
    return fused, a1, a2


# ------------------------------ demo ------------------------------

if __name__ == "__main__":
    SEQ, HIDDEN = 8, 32                    # output_dim = 32

    key = jax.random.PRNGKey(0)
    k1, k2, kw = jax.random.split(key, 3)
    x1 = jax.random.normal(k1, (SEQ, HIDDEN), jnp.float32)
    x2 = jax.random.normal(k2, (SEQ, HIDDEN), jnp.float32)
    attention_weights = jax.random.normal(kw, (HIDDEN,), jnp.float32)

    # ---- single instance (module-equivalent API) ----
    fused, (alpha1, alpha2) = attention_fusion(x1, x2, attention_weights)
    jax.block_until_ready(fused)

    assert fused.shape == (SEQ, HIDDEN)
    assert alpha1.shape == (SEQ,) and alpha2.shape == (SEQ,)

    ref_fused, ref_a1, ref_a2 = _reference(x1, x2, attention_weights)
    assert jnp.allclose(fused, ref_fused, rtol=1e-5, atol=1e-5)
    assert jnp.allclose(alpha1, ref_a1, rtol=1e-5, atol=1e-5)
    assert jnp.allclose(alpha2, ref_a2, rtol=1e-5, atol=1e-5)

    # ---- batched: B instances amortized into one gridded launch ----
    B = 4
    kb1, kb2 = jax.random.split(jax.random.PRNGKey(1), 2)
    xb1 = jax.random.normal(kb1, (B, SEQ, HIDDEN), jnp.float32)
    xb2 = jax.random.normal(kb2, (B, SEQ, HIDDEN), jnp.float32)

    fb, (ab1, ab2) = attention_fusion_batched(xb1, xb2, attention_weights)
    jax.block_until_ready(fb)
    assert fb.shape == (B, SEQ, HIDDEN)
    assert ab1.shape == (B, SEQ) and ab2.shape == (B, SEQ)

    for bidx in range(B):
        rf, r1, r2 = _reference(xb1[bidx], xb2[bidx], attention_weights)
        assert jnp.allclose(fb[bidx], rf, rtol=1e-5, atol=1e-5)
        assert jnp.allclose(ab1[bidx], r1, rtol=1e-5, atol=1e-5)
        assert jnp.allclose(ab2[bidx], r2, rtol=1e-5, atol=1e-5)

    print("KERNEL_OK")
</pallas_src>

<mosaic_0001>
module attributes {stable_mosaic.version = 11 : i64} {
  func.func @attention_fusion_kernel(%arg0: i32, %arg1: memref<1x8x32xf32, #tpu.memory_space<vmem>>, %arg2: memref<1x8x32xf32, #tpu.memory_space<vmem>>, %arg3: memref<1x32xf32, #tpu.memory_space<vmem>>, %arg4: memref<1x8x32xf32, #tpu.memory_space<vmem>>, %arg5: memref<1x8x1xf32, #tpu.memory_space<vmem>>) attributes {dimension_semantics = [#tpu.dimension_semantics<parallel>], iteration_bounds = array<i64: 1>, scalar_prefetch = 0 : i64, scratch_operands = 0 : i64, tpu.core_type = #tpu.core_type<tc>, window_params = [{transform_indices = @transform_0, window_bounds = array<i64: 1, 8, 32>}, {transform_indices = @transform_1, window_bounds = array<i64: 1, 8, 32>}, {pipeline_mode = #tpu.pipeline_mode<synchronous>, transform_indices = @transform_2, window_bounds = array<i64: 1, 32>}, {transform_indices = @transform_3, window_bounds = array<i64: 1, 8, 32>}, {transform_indices = @transform_4, window_bounds = array<i64: 1, 8, 1>}]} {
    %c0 = arith.constant 0 : index
    %c0_0 = arith.constant 0 : index
    %c0_1 = arith.constant 0 : index
    %0 = vector.load %arg1[%c0, %c0_0, %c0_1] : memref<1x8x32xf32, #tpu.memory_space<vmem>>, vector<1x8x32xf32>
    %1 = vector.shape_cast %0 : vector<1x8x32xf32> to vector<8x32xf32>
    %c0_2 = arith.constant 0 : index
    %c0_3 = arith.constant 0 : index
    %c0_4 = arith.constant 0 : index
    %2 = vector.load %arg2[%c0_2, %c0_3, %c0_4] : memref<1x8x32xf32, #tpu.memory_space<vmem>>, vector<1x8x32xf32>
    %3 = vector.shape_cast %2 : vector<1x8x32xf32> to vector<8x32xf32>
    %c0_5 = arith.constant 0 : index
    %c0_6 = arith.constant 0 : index
    %4 = vector.load %arg3[%c0_5, %c0_6] : memref<1x32xf32, #tpu.memory_space<vmem>>, vector<1x32xf32>
    %5 = vector.broadcast %4 : vector<1x32xf32> to vector<8x32xf32>
    %6 = arith.mulf %1, %5 : vector<8x32xf32>
    %cst = arith.constant dense<0.000000e+00> : vector<8xf32>
    %7 = vector.multi_reduction <add>, %6, %cst [1] : vector<8x32xf32> to vector<8xf32>
    %8 = vector.shape_cast %7 : vector<8xf32> to vector<8x1xf32>
    %cst_7 = arith.constant dense<0xFF800000> : vector<1xf32>
    %9 = vector.multi_reduction <maximumf>, %8, %cst_7 [0] : vector<8x1xf32> to vector<1xf32>
    %10 = vector.shape_cast %9 : vector<1xf32> to vector<1x1xf32>
    %11 = vector.broadcast %10 : vector<1x1xf32> to vector<8x1xf32>
    %12 = arith.subf %8, %11 : vector<8x1xf32>
    %13 = math.exp %12 : vector<8x1xf32>
    %cst_8 = arith.constant dense<0.000000e+00> : vector<1xf32>
    %14 = vector.multi_reduction <add>, %13, %cst_8 [0] : vector<8x1xf32> to vector<1xf32>
    %15 = vector.shape_cast %14 : vector<1xf32> to vector<1x1xf32>
    %16 = tpu.reciprocal %15 : vector<1x1xf32> -> vector<1x1xf32>
    %17 = vector.broadcast %16 : vector<1x1xf32> to vector<8x1xf32>
    %18 = arith.mulf %13, %17 : vector<8x1xf32>
    %19 = arith.subf %1, %3 : vector<8x32xf32>
    %20 = vector.broadcast %18 : vector<8x1xf32> to vector<8x32xf32>
    %21 = arith.mulf %20, %19 : vector<8x32xf32>
    %22 = arith.addf %3, %21 : vector<8x32xf32>
    %c0_9 = arith.constant 0 : index
    %c0_10 = arith.constant 0 : index
    %c0_11 = arith.constant 0 : index
    %23 = vector.load %arg4[%c0_9, %c0_10, %c0_11] : memref<1x8x32xf32, #tpu.memory_space<vmem>>, vector<1x8x32xf32>
    %24 = vector.shape_cast %23 : vector<1x8x32xf32> to vector<8x32xf32>
    %25 = vector.shape_cast %22 : vector<8x32xf32> to vector<1x8x32xf32>
    tpu.vector_store %arg4[%c0_9, %c0_10, %c0_11], %25 {strides = array<i32>} : memref<1x8x32xf32, #tpu.memory_space<vmem>>, vector<1x8x32xf32>,
    %c0_12 = arith.constant 0 : index
    %c0_13 = arith.constant 0 : index
    %c0_14 = arith.constant 0 : index
    %26 = vector.load %arg5[%c0_12, %c0_13, %c0_14] : memref<1x8x1xf32, #tpu.memory_space<vmem>>, vector<1x8x1xf32>
    %27 = vector.shape_cast %26 : vector<1x8x1xf32> to vector<8x1xf32>
    %28 = vector.shape_cast %18 : vector<8x1xf32> to vector<1x8x1xf32>
    tpu.vector_store %arg5[%c0_12, %c0_13, %c0_14], %28 {strides = array<i32>} : memref<1x8x1xf32, #tpu.memory_space<vmem>>, vector<1x8x1xf32>,
    return
  }
  func.func @transform_0(%arg0: i32) -> (i32, i32, i32) {
    %c0_i32 = arith.constant 0 : i32
    %c0_i32_0 = arith.constant 0 : i32
    %c0_i32_1 = arith.constant 0 : i32
    return %arg0, %c0_i32, %c0_i32_0 : i32, i32, i32
  }
  func.func @transform_1(%arg0: i32) -> (i32, i32, i32) {
    %c0_i32 = arith.constant 0 : i32
    %c0_i32_0 = arith.constant 0 : i32
    %c0_i32_1 = arith.constant 0 : i32
    return %arg0, %c0_i32, %c0_i32_0 : i32, i32, i32
  }
  func.func @transform_2(%arg0: i32) -> (i32, i32) {
    %c0_i32 = arith.constant 0 : i32
    %c0_i32_0 = arith.constant 0 : i32
    %c0_i32_1 = arith.constant 0 : i32
    return %c0_i32, %c0_i32_0 : i32, i32
  }
  func.func @transform_3(%arg0: i32) -> (i32, i32, i32) {
    %c0_i32 = arith.constant 0 : i32
    %c0_i32_0 = arith.constant 0 : i32
    %c0_i32_1 = arith.constant 0 : i32
    return %arg0, %c0_i32, %c0_i32_0 : i32, i32, i32
  }
  func.func @transform_4(%arg0: i32) -> (i32, i32, i32) {
    %c0_i32 = arith.constant 0 : i32
    %c0_i32_0 = arith.constant 0 : i32
    %c0_i32_1 = arith.constant 0 : i32
    return %arg0, %c0_i32, %c0_i32_0 : i32, i32, i32
  }
}

</mosaic_0001>

<bundles_post_ra>
// kernel: tpu_custom_call.1
= control target key start
LH: loop header
LB: loop body
LE: loop exit
PB: predicated region body
PF: predicated region fallthrough
CT: control target
= control target key end

     0   :  { %10 = vsyncpa [#allocation3], 0  ;;  %s250_s0 = inlined_call_operand.hbm [shape: f32[1,8,32], index: 0, kind: input, shape index: {}]   ;;  %s251_s1 = inlined_call_operand.hbm [shape: f32[1,8,32], index: 1, kind: input, shape index: {}]   ;;  %s252_s2 = inlined_call_operand.vmem [shape: f32[1,32], index: 2, kind: input, shape index: {}]   ;;  %s253_s3 = inlined_call_operand.hbm [shape: f32[1,8,32], index: 3, kind: output, shape index: {0}]   ;;  %s254_s4 = inlined_call_operand.vmem [shape: f32[1,8,1], index: 4, kind: output, shape index: {1}]  }
   0x1   :  { %11 = vsyncpa [#allocation6], 0 }
   0x2   :  { %12 = vsyncpa [#allocation4], 0  ;;  %s178_s15 = smov [#allocation2]   ;;  %s179_s17 = smov [#allocation5]  }
   0x3   :  { %s19_s16 = sshll.u32 %s178_s15, 4  ;;  %s29_s18 = sshll.u32 %s179_s17, 4  ;;  %s20_s16 = int_to_ptr.vmem [resolvable:$true] %s19_s16  ;;  %s30_s18 = int_to_ptr.vmem [resolvable:$true] %s29_s18 }
   0x4   :  { %s106_s21 = scalar_lea.hbm %s250_s0, 128 }
   0x5   :  { %p107_p0 = scmp.ne.s32.totalorder %s250_s0, %s106_s21  ;;  %p110_p1 = scmp.lt.u32.totalorder %s106_s21, %s250_s0 }
   0x7   :  { %p112_p2 = pnand %p110_p1, %p107_p0 }
   0x9   :  { %115 = shalt.err (!%p112_p2)
}
   0xa   :  { %s116_s26 = scalar_lea.vmem %s20_s16, 128  ;;  %p121_p4 = scmp.lt.s32.totalorder %s20_s16, %s20_s16 }
   0xb   :  { %p117_p3 = scmp.ne.s32.totalorder %s20_s16, %s116_s26  ;;  %p122_p5 = scmp.lt.s32.totalorder %s116_s26, %s116_s26 }
   0xd   :  { %p123_p6 = por %p122_p5, %p121_p4 }
   0xf   :  { %p124_p7 = pnand %p123_p6, %p117_p3 }
  0x11   :  { %127 = shalt.err (!%p124_p7)
}
  0x12   :  { %22 = dma.hbm_to_vmem [thread:$0]  %s250_s0, 128, %s20_s16, [#allocation3]  }
  0x13   :  { %s128_s5 = scalar_lea.hbm %s251_s1, 128 }
  0x14   :  { %p129_p8 = scmp.ne.s32.totalorder %s251_s1, %s128_s5  ;;  %p132_p9 = scmp.lt.u32.totalorder %s128_s5, %s251_s1 }
  0x16   :  { %p134_p10 = pnand %p132_p9, %p129_p8 }
  0x18   :  { %137 = shalt.err (!%p134_p10)
}
  0x19   :  { %s138_s10 = scalar_lea.vmem %s30_s18, 128  ;;  %p143_p12 = scmp.lt.s32.totalorder %s30_s18, %s30_s18 }
  0x1a   :  { %p139_p11 = scmp.ne.s32.totalorder %s30_s18, %s138_s10  ;;  %p144_p13 = scmp.lt.s32.totalorder %s138_s10, %s138_s10 }
  0x1c   :  { %p145_p0 = por %p144_p13, %p143_p12 }
  0x1e   :  { %p146_p1 = pnand %p145_p0, %p139_p11 }
  0x20   :  { %149 = shalt.err (!%p146_p1)
}
  0x21   :  { %32 = dma.hbm_to_vmem [thread:$0]  %s251_s1, 128, %s30_s18, [#allocation6]  }
  0x22   :  { %172 = dma.done.wait [#allocation3], 128  }
  0x23   :  { %173 = vsyncadd [#allocation3], 4294967168 }
  0x24   :  { %174 = dma.done.wait [#allocation6], 128  }
  0x25   :  { %175 = vsyncadd [#allocation6], 4294967168  ;;  %v41_v0 = vld [vmem:[#allocation2] sm:$0xff]  ;;  %v98_v1 = vld [vmem:[%s252_s2] ss:$0 sm:$0xff]  ;;  %vm51_vm0 = vcmask 261120  }
  0x26   :  { %v50_v2 = vmul.f32 %v98_v1, %v41_v0  ;;  %v42_v20 = vld [vmem:[#allocation5] sm:$0xff]  ;;  %vm76_vm1 = vcmask 7168   ;;  %s180_s1 = smov [#allocation7]  }
  0x27   :  { %v72_v21 = vsub.f32 %v41_v0, %v42_v20  ;;  %s84_s2 = sshll.u32 %s180_s1, 4  ;;  %s85_s2 = int_to_ptr.vmem [resolvable:$true] %s84_s2 }
  0x28   :  { %v52_v3 = vsel %vm51_vm0, %v50_v2, 0.0  ;;  %s150_s16 = scalar_lea.vmem %s85_s2, 128  ;;  %p155_p3 = scmp.lt.s32.totalorder %s85_s2, %s85_s2 }
  0x29   :  { %53 = vadd.xlane.f32.xlu0 %v52_v3  ;;  %p151_p2 = scmp.ne.s32.totalorder %s85_s2, %s150_s16  ;;  %p156_p4 = scmp.lt.s32.totalorder %s150_s16, %s150_s16 }
  0x2b   :  { %p157_p5 = por %p156_p4, %p155_p3 }
  0x2d   :  { %p158_p6 = pnand %p157_p5, %p151_p2 }
  0xb6   :  { %v54_v4 = vpop.xlane.xlu0 %53 }
  0xb7   :  { %v55_v5 = vrot.slane %v54_v4, 4 }
  0xb9   :  { %v56_v6 = vmax.f32 %v54_v4, %v55_v5 }
  0xbb   :  { %v57_v7 = vrot.slane %v56_v6, 2 }
  0xbd   :  { %v58_v8 = vmax.f32 %v56_v6, %v57_v7 }
  0xbf   :  { %v59_v9 = vrot.slane %v58_v8, 1 }
  0xc1   :  { %v60_v10 = vmax.f32 %v58_v8, %v59_v9 }
  0xc3   :  { %v61_v11 = vsub.f32 %v54_v4, %v60_v10 }
  0xc5   :  { %v62_v12 = vmul.f32 1.442695, %v61_v11 }
  0xc7   :  { %102 = vpow2.f32 %v62_v12 }
  0xd1   :  { %v103_v13 = vpop.eup %102 }
  0xd2   :  { %v64_v14 = vrot.slane %v103_v13, 4 }
  0xd4   :  { %v65_v15 = vadd.f32 %v103_v13, %v64_v14 }
  0xd6   :  { %v66_v16 = vrot.slane %v65_v15, 2 }
  0xd8   :  { %v67_v17 = vadd.f32 %v66_v16, %v65_v15 }
  0xda   :  { %v68_v18 = vrot.slane %v67_v17, 1 }
  0xdc   :  { %v69_v19 = vadd.f32 %v68_v18, %v67_v17 }
  0xde   :  { %104 = vrcp.f32 %v69_v19 }
  0xe8   :  { %v105_v22 = vpop.eup %104 }
  0xe9   :  { %v71_v23 = vmul.f32 %v105_v22, %v103_v13 }
  0xeb   :  { %v73_v24 = vmul.f32 %v72_v21, %v71_v23  ;;  %77 = vst.msk [vmem:[%s254_s4] sm:$0xff] %vm76_vm1, %v71_v23 }
  0xed   :  { %v74_v25 = vadd.f32 %v73_v24, %v42_v20 }
  0xef   :  { %75 = vst.msk [vmem:[#allocation7] sm:$0xff] %vm51_vm0, %v74_v25 }
  0xf0   :  { %161 = shalt.err (!%p158_p6)
}
  0xf1   :  { %s162_s19 = scalar_lea.hbm %s253_s3, 128 }
  0xf2   :  { %p163_p7 = scmp.ne.s32.totalorder %s253_s3, %s162_s19  ;;  %p166_p8 = scmp.lt.u32.totalorder %s162_s19, %s253_s3 }
  0xf4   :  { %p168_p9 = pnand %p166_p8, %p163_p7 }
  0xf6   :  { %171 = shalt.err (!%p168_p9)
}
  0xf7   :  { %87 = dma.vmem_to_hbm [thread:$0]  %s85_s2, 128, %s253_s3, [#allocation4]  }
  0xf8   :  { %176 = dma.done.wait [#allocation4], 128  }
  0xf9   :  { %177 = vsyncadd [#allocation4], 4294967168 }
  0xfa   :  { %95 = vsyncpa [#allocation3], 1 }
  0xfb   :  { %96 = vsyncpa [#allocation6], 1 }
  0xfc   :  { %97 = vsyncpa [#allocation4], 1 }

</bundles_post_ra>
